<compile_context>
chip_gen: v7x
topology: tpu7x:2x2x1
jax: 0.10.0
libtpu: 0.0.40
codegen_flags: <defaults>
</compile_context>

<pallas_src>
import jax
import jax.numpy as jnp
from jax import lax
from jax.experimental import pallas as pl
from jax.experimental.pallas import tpu as pltpu

TAU = 1.0
EPS = 1e-8
NORM_EPS = 1e-12      # F.normalize denominator clamp
ROLL_SCALE = 0.1      # scale applied to rolled m for iterations i >= 1

# Optionally feed the MXU in bf16 for large D (exp/log amplify the ~1e-3 bf16
# rounding of the gram, so off by default to match f32 PyTorch semantics).
USE_BF16_MATMUL = False


def _l2norm(x):
    nrm = jnp.sqrt(jnp.sum(x * x, axis=-1, keepdims=True))
    return x / jnp.maximum(nrm, jnp.float32(NORM_EPS))


def _gram(a, b):
    """a @ b^T with f32 accumulation (optionally bf16 MXU operands)."""
    if USE_BF16_MATMUL:
        a = a.astype(jnp.bfloat16)
        b = b.astype(jnp.bfloat16)
    return lax.dot_general(a, b,
                           dimension_numbers=(((1,), (1,)), ((), ())),
                           preferred_element_type=jnp.float32)


def _ntxent_kernel(zi_ref, zj_ref, m_ref, n_ref, loss_ref):
    bs = zi_ref.shape[0]
    inv_tau = jnp.float32(1.0 / TAU)
    s = jnp.float32(ROLL_SCALE)

    zi_n = _l2norm(zi_ref[...])
    zj_n = _l2norm(zj_ref[...])
    m_n = _l2norm(m_ref[...])
    n_n = _l2norm(n_ref[...])
    zj0 = zj_n + n_n                      # fixed bottom half of Z for all iters

    # In-kernel identity mask (no mask arrays streamed from HBM).
    rows = lax.broadcasted_iota(jnp.int32, (bs, bs), 0)
    cols = lax.broadcasted_iota(jnp.int32, (bs, bs), 1)
    eye = (rows == cols).astype(jnp.float32)

    def row_sums(e):                      # [bs,bs] -> ([bs,1] full, [bs,1] diag)
        return (jnp.sum(e, axis=1, keepdims=True),
                jnp.sum(e * eye, axis=1, keepdims=True))

    def col_sums(e):                      # [bs,bs] -> ([1,bs] full, [1,bs] diag)
        return (jnp.sum(e, axis=0, keepdims=True),
                jnp.sum(e * eye, axis=0, keepdims=True))

    # ---- roll-invariant pieces (each computed exactly once) ----------------
    g_zj = _gram(zi_n, zj0)                        # zi  . zj0^T
    g_mj = _gram(m_n, zj0)                         # m   . zj0^T
    e_d = jnp.exp(_gram(zj0, zj0) * inv_tau)       # lower-right quadrant

    # Iteration 0 (scale 1.0 on m) — also defines the positive pairs.
    zi0 = zi_n + m_n
    e_a0 = jnp.exp(_gram(zi0, zi0) * inv_tau)
    e_b0 = jnp.exp((g_zj + g_mj) * inv_tau)        # zi0 . zj0^T, no extra matmul
    a0_row, a0_diag = row_sums(e_a0)
    b0_row, b0_diag = row_sums(e_b0)
    b0_col, b0_diag_r = col_sums(e_b0)
    pos_col = b0_diag                              # positives, top rows  [bs,1]
    pos_row = b0_diag_r                            # positives, bot rows  [1,bs]
    ntop0 = a0_row - a0_diag + b0_row - b0_diag    # [bs,1]
    nbot0 = b0_col - b0_diag_r                     # [1,bs]

    # Iterations 1..bs-1, upper-right/lower-left quadrants, in CLOSED FORM:
    #   sum_{i=1..bs-1} exp(B_i/tau) = E_zj * (colsum(Rj) - Rj)
    e_zj = jnp.exp(g_zj * inv_tau)
    rj = jnp.exp(s * g_mj * inv_tau)
    t = e_zj * (jnp.sum(rj, axis=0, keepdims=True) - rj)      # [bs,bs]
    t_row, t_diag_c = row_sums(t)
    t_col, t_diag_r = col_sums(t)

    # Iterations 1..bs-1, upper-left quadrant: one bs x bs gram + one exp per
    # step; m rolled cumulatively by one row on the XLU (sublane rotate only).
    def body(_, carry):
        m_cur, acc = carry
        m_cur = pltpu.roll(m_cur, shift=1, axis=0)
        zi_cur = zi_n + s * m_cur
        e_a = jnp.exp(_gram(zi_cur, zi_cur) * inv_tau)
        a_row, a_diag = row_sums(e_a)
        return m_cur, acc + (a_row - a_diag)

    _, ntop_loop = lax.fori_loop(1, bs, body,
                                 (m_n, jnp.zeros((bs, 1), jnp.float32)),
                                 unroll=(bs <= 32))

    d_col, d_diag = col_sums(e_d)                  # symmetric: col == row sums
    neg_top = ntop0 + ntop_loop + (t_row - t_diag_c)                   # [bs,1]
    neg_bot = nbot0 + (t_col - t_diag_r) + jnp.float32(bs) * (d_col - d_diag)

    vals_top = -jnp.log(pos_col / (neg_top + jnp.float32(EPS)))        # [bs,1]
    vals_bot = -jnp.log(pos_row / (neg_bot + jnp.float32(EPS)))        # [1,bs]
    loss_ref[...] = ((jnp.sum(vals_top, keepdims=True)
                      + jnp.sum(vals_bot, keepdims=True))
                     / jnp.float32(2 * bs))


def ntxent_loss_pallas(zi, zj, m, n):
    # TODO(synk): for very large bs, add a grid (row blocks "parallel" for
    # megacore, roll iterations "arbitrary") and tile the gram columns.
    out = pl.pallas_call(
        _ntxent_kernel,
        out_shape=jax.ShapeDtypeStruct((1, 1), jnp.float32),
        in_specs=[pl.BlockSpec(memory_space=pltpu.MemorySpace.VMEM)] * 4,
        out_specs=pl.BlockSpec(memory_space=pltpu.MemorySpace.VMEM),
    )(zi.astype(jnp.float32), zj.astype(jnp.float32),
      m.astype(jnp.float32), n.astype(jnp.float32))
    return out[0, 0]


# ----------------------------- pure-JAX reference ---------------------------
def make_masks(bs):
    two = 2 * bs
    eye = jnp.eye(two, dtype=jnp.float32)
    pos_mask = jnp.roll(eye, bs, axis=1)          # 1 at (r, (r+bs) % 2bs)
    neg_mask = 1.0 - eye - pos_mask
    return pos_mask, neg_mask


def ntxent_loss_ref(zi, zj, m, n):
    """Pure-JAX reference mirroring the PyTorch forward."""
    def norm(x):
        return x / jnp.maximum(jnp.linalg.norm(x, axis=1, keepdims=True),
                               NORM_EPS)
    zi_n, zj_n, m_n, n_n = norm(zi), norm(zj), norm(m), norm(n)
    bs = zi.shape[0]
    pos_mask, neg_mask = make_masks(bs)
    zj0 = zj_n + n_n
    pos = None
    neg_sum = jnp.zeros((2 * bs,), jnp.float32)
    for i in range(bs):
        if i == 0:
            zcur = zi_n + m_n
        else:
            zcur = zi_n + 0.1 * jnp.roll(m_n, i, axis=0)
        z_all = jnp.concatenate([zcur, zj0], axis=0)
        sim = jnp.exp(z_all @ z_all.T / TAU)
        if i == 0:
            pos = jnp.sum(sim * pos_mask, axis=1)
        neg_sum = neg_sum + jnp.sum(sim * neg_mask, axis=1)
    return jnp.mean(-jnp.log(pos / (neg_sum + EPS)))


if __name__ == "__main__":
    bs, d = 8, 32
    key = jax.random.PRNGKey(0)
    k1, k2, k3, k4 = jax.random.split(key, 4)
    zi = jax.random.normal(k1, (bs, d), jnp.float32)
    zj = jax.random.normal(k2, (bs, d), jnp.float32)
    m = jax.random.normal(k3, (bs, d), jnp.float32)
    n = jax.random.normal(k4, (bs, d), jnp.float32)

    loss = jax.jit(ntxent_loss_pallas)(zi, zj, m, n)
    jax.block_until_ready(loss)

    ref = ntxent_loss_ref(zi, zj, m, n)
    assert jnp.allclose(loss, ref, atol=1e-4, rtol=1e-4), (loss, ref)

    print("KERNEL_OK")
</pallas_src>

<mosaic_0001>
module attributes {stable_mosaic.version = 11 : i64} {
  func.func @_ntxent_kernel(%arg0: memref<8x32xf32, #tpu.memory_space<vmem>>, %arg1: memref<8x32xf32, #tpu.memory_space<vmem>>, %arg2: memref<8x32xf32, #tpu.memory_space<vmem>>, %arg3: memref<8x32xf32, #tpu.memory_space<vmem>>, %arg4: memref<1x1xf32, #tpu.memory_space<vmem>>) attributes {dimension_semantics = [], scalar_prefetch = 0 : i64, scratch_operands = 0 : i64, tpu.core_type = #tpu.core_type<tc>} {
    %c0 = arith.constant 0 : index
    %c0_0 = arith.constant 0 : index
    %0 = vector.load %arg0[%c0, %c0_0] : memref<8x32xf32, #tpu.memory_space<vmem>>, vector<8x32xf32>
    %1 = arith.mulf %0, %0 : vector<8x32xf32>
    %cst = arith.constant dense<0.000000e+00> : vector<8xf32>
    %2 = vector.multi_reduction <add>, %1, %cst [1] : vector<8x32xf32> to vector<8xf32>
    %3 = vector.shape_cast %2 : vector<8xf32> to vector<8x1xf32>
    %4 = math.sqrt %3 : vector<8x1xf32>
    %cst_1 = arith.constant 9.99999996E-13 : f32
    %5 = vector.broadcast %cst_1 : f32 to vector<8x1xf32>
    %6 = arith.maximumf %4, %5 : vector<8x1xf32>
    %7 = vector.broadcast %6 : vector<8x1xf32> to vector<8x32xf32>
    %8 = arith.divf %0, %7 : vector<8x32xf32>
    %c0_2 = arith.constant 0 : index
    %c0_3 = arith.constant 0 : index
    %9 = vector.load %arg1[%c0_2, %c0_3] : memref<8x32xf32, #tpu.memory_space<vmem>>, vector<8x32xf32>
    %10 = arith.mulf %9, %9 : vector<8x32xf32>
    %cst_4 = arith.constant dense<0.000000e+00> : vector<8xf32>
    %11 = vector.multi_reduction <add>, %10, %cst_4 [1] : vector<8x32xf32> to vector<8xf32>
    %12 = vector.shape_cast %11 : vector<8xf32> to vector<8x1xf32>
    %13 = math.sqrt %12 : vector<8x1xf32>
    %cst_5 = arith.constant 9.99999996E-13 : f32
    %14 = vector.broadcast %cst_5 : f32 to vector<8x1xf32>
    %15 = arith.maximumf %13, %14 : vector<8x1xf32>
    %16 = vector.broadcast %15 : vector<8x1xf32> to vector<8x32xf32>
    %17 = arith.divf %9, %16 : vector<8x32xf32>
    %c0_6 = arith.constant 0 : index
    %c0_7 = arith.constant 0 : index
    %18 = vector.load %arg2[%c0_6, %c0_7] : memref<8x32xf32, #tpu.memory_space<vmem>>, vector<8x32xf32>
    %19 = arith.mulf %18, %18 : vector<8x32xf32>
    %cst_8 = arith.constant dense<0.000000e+00> : vector<8xf32>
    %20 = vector.multi_reduction <add>, %19, %cst_8 [1] : vector<8x32xf32> to vector<8xf32>
    %21 = vector.shape_cast %20 : vector<8xf32> to vector<8x1xf32>
    %22 = math.sqrt %21 : vector<8x1xf32>
    %cst_9 = arith.constant 9.99999996E-13 : f32
    %23 = vector.broadcast %cst_9 : f32 to vector<8x1xf32>
    %24 = arith.maximumf %22, %23 : vector<8x1xf32>
    %25 = vector.broadcast %24 : vector<8x1xf32> to vector<8x32xf32>
    %26 = arith.divf %18, %25 : vector<8x32xf32>
    %c0_10 = arith.constant 0 : index
    %c0_11 = arith.constant 0 : index
    %27 = vector.load %arg3[%c0_10, %c0_11] : memref<8x32xf32, #tpu.memory_space<vmem>>, vector<8x32xf32>
    %28 = arith.mulf %27, %27 : vector<8x32xf32>
    %cst_12 = arith.constant dense<0.000000e+00> : vector<8xf32>
    %29 = vector.multi_reduction <add>, %28, %cst_12 [1] : vector<8x32xf32> to vector<8xf32>
    %30 = vector.shape_cast %29 : vector<8xf32> to vector<8x1xf32>
    %31 = math.sqrt %30 : vector<8x1xf32>
    %cst_13 = arith.constant 9.99999996E-13 : f32
    %32 = vector.broadcast %cst_13 : f32 to vector<8x1xf32>
    %33 = arith.maximumf %31, %32 : vector<8x1xf32>
    %34 = vector.broadcast %33 : vector<8x1xf32> to vector<8x32xf32>
    %35 = arith.divf %27, %34 : vector<8x32xf32>
    %36 = arith.addf %17, %35 : vector<8x32xf32>
    %37 = tpu.iota {dimensions = array<i32: 0>} : vector<8x8xi32>
    %38 = tpu.iota {dimensions = array<i32: 1>} : vector<8x8xi32>
    %39 = arith.cmpi eq, %37, %38 : vector<8x8xi32>
    %40 = arith.extui %39 : vector<8x8xi1> to vector<8x8xi32>
    %41 = arith.sitofp %40 : vector<8x8xi32> to vector<8x8xf32>
    %cst_14 = arith.constant dense<0.000000e+00> : vector<8x8xf32>
    %42 = tpu.matmul %8, %36, %cst_14 {dimension_numbers = #tpu.dot_dimension_numbers<[1], [1], [0], [0], [0, 0, 1, 0], [], []>} : vector<8x32xf32>, vector<8x32xf32>, vector<8x8xf32> -> vector<8x8xf32>
    %cst_15 = arith.constant dense<0.000000e+00> : vector<8x8xf32>
    %43 = tpu.matmul %26, %36, %cst_15 {dimension_numbers = #tpu.dot_dimension_numbers<[1], [1], [0], [0], [0, 0, 1, 0], [], []>} : vector<8x32xf32>, vector<8x32xf32>, vector<8x8xf32> -> vector<8x8xf32>
    %cst_16 = arith.constant dense<0.000000e+00> : vector<8x8xf32>
    %44 = tpu.matmul %36, %36, %cst_16 {dimension_numbers = #tpu.dot_dimension_numbers<[1], [1], [0], [0], [0, 0, 1, 0], [], []>} : vector<8x32xf32>, vector<8x32xf32>, vector<8x8xf32> -> vector<8x8xf32>
    %cst_17 = arith.constant 1.000000e+00 : f32
    %45 = vector.broadcast %cst_17 : f32 to vector<8x8xf32>
    %46 = arith.mulf %44, %45 : vector<8x8xf32>
    %47 = math.exp %46 : vector<8x8xf32>
    %48 = arith.addf %8, %26 : vector<8x32xf32>
    %cst_18 = arith.constant dense<0.000000e+00> : vector<8x8xf32>
    %49 = tpu.matmul %48, %48, %cst_18 {dimension_numbers = #tpu.dot_dimension_numbers<[1], [1], [0], [0], [0, 0, 1, 0], [], []>} : vector<8x32xf32>, vector<8x32xf32>, vector<8x8xf32> -> vector<8x8xf32>
    %cst_19 = arith.constant 1.000000e+00 : f32
    %50 = vector.broadcast %cst_19 : f32 to vector<8x8xf32>
    %51 = arith.mulf %49, %50 : vector<8x8xf32>
    %52 = math.exp %51 : vector<8x8xf32>
    %53 = arith.addf %42, %43 : vector<8x8xf32>
    %cst_20 = arith.constant 1.000000e+00 : f32
    %54 = vector.broadcast %cst_20 : f32 to vector<8x8xf32>
    %55 = arith.mulf %53, %54 : vector<8x8xf32>
    %56 = math.exp %55 : vector<8x8xf32>
    %cst_21 = arith.constant dense<0.000000e+00> : vector<8xf32>
    %57 = vector.multi_reduction <add>, %52, %cst_21 [1] : vector<8x8xf32> to vector<8xf32>
    %58 = vector.shape_cast %57 : vector<8xf32> to vector<8x1xf32>
    %59 = arith.mulf %52, %41 : vector<8x8xf32>
    %cst_22 = arith.constant dense<0.000000e+00> : vector<8xf32>
    %60 = vector.multi_reduction <add>, %59, %cst_22 [1] : vector<8x8xf32> to vector<8xf32>
    %61 = vector.shape_cast %60 : vector<8xf32> to vector<8x1xf32>
    %cst_23 = arith.constant dense<0.000000e+00> : vector<8xf32>
    %62 = vector.multi_reduction <add>, %56, %cst_23 [1] : vector<8x8xf32> to vector<8xf32>
    %63 = vector.shape_cast %62 : vector<8xf32> to vector<8x1xf32>
    %64 = arith.mulf %56, %41 : vector<8x8xf32>
    %cst_24 = arith.constant dense<0.000000e+00> : vector<8xf32>
    %65 = vector.multi_reduction <add>, %64, %cst_24 [1] : vector<8x8xf32> to vector<8xf32>
    %66 = vector.shape_cast %65 : vector<8xf32> to vector<8x1xf32>
    %cst_25 = arith.constant dense<0.000000e+00> : vector<8xf32>
    %67 = vector.multi_reduction <add>, %56, %cst_25 [0] : vector<8x8xf32> to vector<8xf32>
    %68 = vector.shape_cast %67 : vector<8xf32> to vector<1x8xf32>
    %69 = arith.mulf %56, %41 : vector<8x8xf32>
    %cst_26 = arith.constant dense<0.000000e+00> : vector<8xf32>
    %70 = vector.multi_reduction <add>, %69, %cst_26 [0] : vector<8x8xf32> to vector<8xf32>
    %71 = vector.shape_cast %70 : vector<8xf32> to vector<1x8xf32>
    %72 = arith.subf %58, %61 : vector<8x1xf32>
    %73 = arith.addf %72, %63 : vector<8x1xf32>
    %74 = arith.subf %73, %66 : vector<8x1xf32>
    %75 = arith.subf %68, %71 : vector<1x8xf32>
    %cst_27 = arith.constant 1.000000e+00 : f32
    %76 = vector.broadcast %cst_27 : f32 to vector<8x8xf32>
    %77 = arith.mulf %42, %76 : vector<8x8xf32>
    %78 = math.exp %77 : vector<8x8xf32>
    %cst_28 = arith.constant 1.000000e-01 : f32
    %79 = vector.broadcast %cst_28 : f32 to vector<8x8xf32>
    %80 = arith.mulf %79, %43 : vector<8x8xf32>
    %cst_29 = arith.constant 1.000000e+00 : f32
    %81 = vector.broadcast %cst_29 : f32 to vector<8x8xf32>
    %82 = arith.mulf %80, %81 : vector<8x8xf32>
    %83 = math.exp %82 : vector<8x8xf32>
    %cst_30 = arith.constant dense<0.000000e+00> : vector<8xf32>
    %84 = vector.multi_reduction <add>, %83, %cst_30 [0] : vector<8x8xf32> to vector<8xf32>
    %85 = vector.shape_cast %84 : vector<8xf32> to vector<1x8xf32>
    %86 = vector.broadcast %85 : vector<1x8xf32> to vector<8x8xf32>
    %87 = arith.subf %86, %83 : vector<8x8xf32>
    %88 = arith.mulf %78, %87 : vector<8x8xf32>
    %cst_31 = arith.constant dense<0.000000e+00> : vector<8xf32>
    %89 = vector.multi_reduction <add>, %88, %cst_31 [1] : vector<8x8xf32> to vector<8xf32>
    %90 = vector.shape_cast %89 : vector<8xf32> to vector<8x1xf32>
    %91 = arith.mulf %88, %41 : vector<8x8xf32>
    %cst_32 = arith.constant dense<0.000000e+00> : vector<8xf32>
    %92 = vector.multi_reduction <add>, %91, %cst_32 [1] : vector<8x8xf32> to vector<8xf32>
    %93 = vector.shape_cast %92 : vector<8xf32> to vector<8x1xf32>
    %cst_33 = arith.constant dense<0.000000e+00> : vector<8xf32>
    %94 = vector.multi_reduction <add>, %88, %cst_33 [0] : vector<8x8xf32> to vector<8xf32>
    %95 = vector.shape_cast %94 : vector<8xf32> to vector<1x8xf32>
    %96 = arith.mulf %88, %41 : vector<8x8xf32>
    %cst_34 = arith.constant dense<0.000000e+00> : vector<8xf32>
    %97 = vector.multi_reduction <add>, %96, %cst_34 [0] : vector<8x8xf32> to vector<8xf32>
    %98 = vector.shape_cast %97 : vector<8xf32> to vector<1x8xf32>
    %cst_35 = arith.constant 0.000000e+00 : f32
    %99 = vector.broadcast %cst_35 : f32 to vector<8x1xf32>
    %cst_36 = arith.constant 1.000000e-01 : f32
    %cst_37 = arith.constant 1.000000e+00 : f32
    %c0_i32 = arith.constant 0 : i32
    %c1_i32 = arith.constant 1 : i32
    %100 = tpu.dynamic_rotate %26 by %c1_i32 dim 0 : vector<8x32xf32>, i32 -> vector<8x32xf32>
    %101 = vector.broadcast %cst_36 : f32 to vector<8x32xf32>
    %102 = arith.mulf %101, %100 : vector<8x32xf32>
    %103 = arith.addf %8, %102 : vector<8x32xf32>
    %cst_38 = arith.constant dense<0.000000e+00> : vector<8x8xf32>
    %104 = tpu.matmul %103, %103, %cst_38 {dimension_numbers = #tpu.dot_dimension_numbers<[1], [1], [0], [0], [0, 0, 1, 0], [], []>} : vector<8x32xf32>, vector<8x32xf32>, vector<8x8xf32> -> vector<8x8xf32>
    %105 = vector.broadcast %cst_37 : f32 to vector<8x8xf32>
    %106 = arith.mulf %104, %105 : vector<8x8xf32>
    %107 = math.exp %106 : vector<8x8xf32>
    %cst_39 = arith.constant dense<0.000000e+00> : vector<8xf32>
    %108 = vector.multi_reduction <add>, %107, %cst_39 [1] : vector<8x8xf32> to vector<8xf32>
    %109 = vector.shape_cast %108 : vector<8xf32> to vector<8x1xf32>
    %110 = arith.mulf %107, %41 : vector<8x8xf32>
    %cst_40 = arith.constant dense<0.000000e+00> : vector<8xf32>
    %111 = vector.multi_reduction <add>, %110, %cst_40 [1] : vector<8x8xf32> to vector<8xf32>
    %112 = vector.shape_cast %111 : vector<8xf32> to vector<8x1xf32>
    %113 = arith.subf %109, %112 : vector<8x1xf32>
    %114 = arith.addf %99, %113 : vector<8x1xf32>
    %c1_i32_41 = arith.constant 1 : i32
    %c1_i32_42 = arith.constant 1 : i32
    %115 = tpu.dynamic_rotate %100 by %c1_i32_42 dim 0 : vector<8x32xf32>, i32 -> vector<8x32xf32>
    %116 = vector.broadcast %cst_36 : f32 to vector<8x32xf32>
    %117 = arith.mulf %116, %115 : vector<8x32xf32>
    %118 = arith.addf %8, %117 : vector<8x32xf32>
    %cst_43 = arith.constant dense<0.000000e+00> : vector<8x8xf32>
    %119 = tpu.matmul %118, %118, %cst_43 {dimension_numbers = #tpu.dot_dimension_numbers<[1], [1], [0], [0], [0, 0, 1, 0], [], []>} : vector<8x32xf32>, vector<8x32xf32>, vector<8x8xf32> -> vector<8x8xf32>
    %120 = vector.broadcast %cst_37 : f32 to vector<8x8xf32>
    %121 = arith.mulf %119, %120 : vector<8x8xf32>
    %122 = math.exp %121 : vector<8x8xf32>
    %cst_44 = arith.constant dense<0.000000e+00> : vector<8xf32>
    %123 = vector.multi_reduction <add>, %122, %cst_44 [1] : vector<8x8xf32> to vector<8xf32>
    %124 = vector.shape_cast %123 : vector<8xf32> to vector<8x1xf32>
    %125 = arith.mulf %122, %41 : vector<8x8xf32>
    %cst_45 = arith.constant dense<0.000000e+00> : vector<8xf32>
    %126 = vector.multi_reduction <add>, %125, %cst_45 [1] : vector<8x8xf32> to vector<8xf32>
    %127 = vector.shape_cast %126 : vector<8xf32> to vector<8x1xf32>
    %128 = arith.subf %124, %127 : vector<8x1xf32>
    %129 = arith.addf %114, %128 : vector<8x1xf32>
    %c2_i32 = arith.constant 2 : i32
    %c1_i32_46 = arith.constant 1 : i32
    %130 = tpu.dynamic_rotate %115 by %c1_i32_46 dim 0 : vector<8x32xf32>, i32 -> vector<8x32xf32>
    %131 = vector.broadcast %cst_36 : f32 to vector<8x32xf32>
    %132 = arith.mulf %131, %130 : vector<8x32xf32>
    %133 = arith.addf %8, %132 : vector<8x32xf32>
    %cst_47 = arith.constant dense<0.000000e+00> : vector<8x8xf32>
    %134 = tpu.matmul %133, %133, %cst_47 {dimension_numbers = #tpu.dot_dimension_numbers<[1], [1], [0], [0], [0, 0, 1, 0], [], []>} : vector<8x32xf32>, vector<8x32xf32>, vector<8x8xf32> -> vector<8x8xf32>
    %135 = vector.broadcast %cst_37 : f32 to vector<8x8xf32>
    %136 = arith.mulf %134, %135 : vector<8x8xf32>
    %137 = math.exp %136 : vector<8x8xf32>
    %cst_48 = arith.constant dense<0.000000e+00> : vector<8xf32>
    %138 = vector.multi_reduction <add>, %137, %cst_48 [1] : vector<8x8xf32> to vector<8xf32>
    %139 = vector.shape_cast %138 : vector<8xf32> to vector<8x1xf32>
    %140 = arith.mulf %137, %41 : vector<8x8xf32>
    %cst_49 = arith.constant dense<0.000000e+00> : vector<8xf32>
    %141 = vector.multi_reduction <add>, %140, %cst_49 [1] : vector<8x8xf32> to vector<8xf32>
    %142 = vector.shape_cast %141 : vector<8xf32> to vector<8x1xf32>
    %143 = arith.subf %139, %142 : vector<8x1xf32>
    %144 = arith.addf %129, %143 : vector<8x1xf32>
    %c3_i32 = arith.constant 3 : i32
    %c1_i32_50 = arith.constant 1 : i32
    %145 = tpu.dynamic_rotate %130 by %c1_i32_50 dim 0 : vector<8x32xf32>, i32 -> vector<8x32xf32>
    %146 = vector.broadcast %cst_36 : f32 to vector<8x32xf32>
    %147 = arith.mulf %146, %145 : vector<8x32xf32>
    %148 = arith.addf %8, %147 : vector<8x32xf32>
    %cst_51 = arith.constant dense<0.000000e+00> : vector<8x8xf32>
    %149 = tpu.matmul %148, %148, %cst_51 {dimension_numbers = #tpu.dot_dimension_numbers<[1], [1], [0], [0], [0, 0, 1, 0], [], []>} : vector<8x32xf32>, vector<8x32xf32>, vector<8x8xf32> -> vector<8x8xf32>
    %150 = vector.broadcast %cst_37 : f32 to vector<8x8xf32>
    %151 = arith.mulf %149, %150 : vector<8x8xf32>
    %152 = math.exp %151 : vector<8x8xf32>
    %cst_52 = arith.constant dense<0.000000e+00> : vector<8xf32>
    %153 = vector.multi_reduction <add>, %152, %cst_52 [1] : vector<8x8xf32> to vector<8xf32>
    %154 = vector.shape_cast %153 : vector<8xf32> to vector<8x1xf32>
    %155 = arith.mulf %152, %41 : vector<8x8xf32>
    %cst_53 = arith.constant dense<0.000000e+00> : vector<8xf32>
    %156 = vector.multi_reduction <add>, %155, %cst_53 [1] : vector<8x8xf32> to vector<8xf32>
    %157 = vector.shape_cast %156 : vector<8xf32> to vector<8x1xf32>
    %158 = arith.subf %154, %157 : vector<8x1xf32>
    %159 = arith.addf %144, %158 : vector<8x1xf32>
    %c4_i32 = arith.constant 4 : i32
    %c1_i32_54 = arith.constant 1 : i32
    %160 = tpu.dynamic_rotate %145 by %c1_i32_54 dim 0 : vector<8x32xf32>, i32 -> vector<8x32xf32>
    %161 = vector.broadcast %cst_36 : f32 to vector<8x32xf32>
    %162 = arith.mulf %161, %160 : vector<8x32xf32>
    %163 = arith.addf %8, %162 : vector<8x32xf32>
    %cst_55 = arith.constant dense<0.000000e+00> : vector<8x8xf32>
    %164 = tpu.matmul %163, %163, %cst_55 {dimension_numbers = #tpu.dot_dimension_numbers<[1], [1], [0], [0], [0, 0, 1, 0], [], []>} : vector<8x32xf32>, vector<8x32xf32>, vector<8x8xf32> -> vector<8x8xf32>
    %165 = vector.broadcast %cst_37 : f32 to vector<8x8xf32>
    %166 = arith.mulf %164, %165 : vector<8x8xf32>
    %167 = math.exp %166 : vector<8x8xf32>
    %cst_56 = arith.constant dense<0.000000e+00> : vector<8xf32>
    %168 = vector.multi_reduction <add>, %167, %cst_56 [1] : vector<8x8xf32> to vector<8xf32>
    %169 = vector.shape_cast %168 : vector<8xf32> to vector<8x1xf32>
    %170 = arith.mulf %167, %41 : vector<8x8xf32>
    %cst_57 = arith.constant dense<0.000000e+00> : vector<8xf32>
    %171 = vector.multi_reduction <add>, %170, %cst_57 [1] : vector<8x8xf32> to vector<8xf32>
    %172 = vector.shape_cast %171 : vector<8xf32> to vector<8x1xf32>
    %173 = arith.subf %169, %172 : vector<8x1xf32>
    %174 = arith.addf %159, %173 : vector<8x1xf32>
    %c5_i32 = arith.constant 5 : i32
    %c1_i32_58 = arith.constant 1 : i32
    %175 = tpu.dynamic_rotate %160 by %c1_i32_58 dim 0 : vector<8x32xf32>, i32 -> vector<8x32xf32>
    %176 = vector.broadcast %cst_36 : f32 to vector<8x32xf32>
    %177 = arith.mulf %176, %175 : vector<8x32xf32>
    %178 = arith.addf %8, %177 : vector<8x32xf32>
    %cst_59 = arith.constant dense<0.000000e+00> : vector<8x8xf32>
    %179 = tpu.matmul %178, %178, %cst_59 {dimension_numbers = #tpu.dot_dimension_numbers<[1], [1], [0], [0], [0, 0, 1, 0], [], []>} : vector<8x32xf32>, vector<8x32xf32>, vector<8x8xf32> -> vector<8x8xf32>
    %180 = vector.broadcast %cst_37 : f32 to vector<8x8xf32>
    %181 = arith.mulf %179, %180 : vector<8x8xf32>
    %182 = math.exp %181 : vector<8x8xf32>
    %cst_60 = arith.constant dense<0.000000e+00> : vector<8xf32>
    %183 = vector.multi_reduction <add>, %182, %cst_60 [1] : vector<8x8xf32> to vector<8xf32>
    %184 = vector.shape_cast %183 : vector<8xf32> to vector<8x1xf32>
    %185 = arith.mulf %182, %41 : vector<8x8xf32>
    %cst_61 = arith.constant dense<0.000000e+00> : vector<8xf32>
    %186 = vector.multi_reduction <add>, %185, %cst_61 [1] : vector<8x8xf32> to vector<8xf32>
    %187 = vector.shape_cast %186 : vector<8xf32> to vector<8x1xf32>
    %188 = arith.subf %184, %187 : vector<8x1xf32>
    %189 = arith.addf %174, %188 : vector<8x1xf32>
    %c6_i32 = arith.constant 6 : i32
    %c1_i32_62 = arith.constant 1 : i32
    %190 = tpu.dynamic_rotate %175 by %c1_i32_62 dim 0 : vector<8x32xf32>, i32 -> vector<8x32xf32>
    %191 = vector.broadcast %cst_36 : f32 to vector<8x32xf32>
    %192 = arith.mulf %191, %190 : vector<8x32xf32>
    %193 = arith.addf %8, %192 : vector<8x32xf32>
    %cst_63 = arith.constant dense<0.000000e+00> : vector<8x8xf32>
    %194 = tpu.matmul %193, %193, %cst_63 {dimension_numbers = #tpu.dot_dimension_numbers<[1], [1], [0], [0], [0, 0, 1, 0], [], []>} : vector<8x32xf32>, vector<8x32xf32>, vector<8x8xf32> -> vector<8x8xf32>
    %195 = vector.broadcast %cst_37 : f32 to vector<8x8xf32>
    %196 = arith.mulf %194, %195 : vector<8x8xf32>
    %197 = math.exp %196 : vector<8x8xf32>
    %cst_64 = arith.constant dense<0.000000e+00> : vector<8xf32>
    %198 = vector.multi_reduction <add>, %197, %cst_64 [1] : vector<8x8xf32> to vector<8xf32>
    %199 = vector.shape_cast %198 : vector<8xf32> to vector<8x1xf32>
    %200 = arith.mulf %197, %41 : vector<8x8xf32>
    %cst_65 = arith.constant dense<0.000000e+00> : vector<8xf32>
    %201 = vector.multi_reduction <add>, %200, %cst_65 [1] : vector<8x8xf32> to vector<8xf32>
    %202 = vector.shape_cast %201 : vector<8xf32> to vector<8x1xf32>
    %203 = arith.subf %199, %202 : vector<8x1xf32>
    %204 = arith.addf %189, %203 : vector<8x1xf32>
    %cst_66 = arith.constant dense<0.000000e+00> : vector<8xf32>
    %205 = vector.multi_reduction <add>, %47, %cst_66 [0] : vector<8x8xf32> to vector<8xf32>
    %206 = vector.shape_cast %205 : vector<8xf32> to vector<1x8xf32>
    %207 = arith.mulf %47, %41 : vector<8x8xf32>
    %cst_67 = arith.constant dense<0.000000e+00> : vector<8xf32>
    %208 = vector.multi_reduction <add>, %207, %cst_67 [0] : vector<8x8xf32> to vector<8xf32>
    %209 = vector.shape_cast %208 : vector<8xf32> to vector<1x8xf32>
    %210 = arith.addf %74, %204 : vector<8x1xf32>
    %211 = arith.subf %90, %93 : vector<8x1xf32>
    %212 = arith.addf %210, %211 : vector<8x1xf32>
    %213 = arith.subf %95, %98 : vector<1x8xf32>
    %214 = arith.addf %75, %213 : vector<1x8xf32>
    %215 = arith.subf %206, %209 : vector<1x8xf32>
    %cst_68 = arith.constant 8.000000e+00 : f32
    %216 = vector.broadcast %cst_68 : f32 to vector<1x8xf32>
    %217 = arith.mulf %216, %215 : vector<1x8xf32>
    %218 = arith.addf %214, %217 : vector<1x8xf32>
    %cst_69 = arith.constant 9.99999993E-9 : f32
    %219 = vector.broadcast %cst_69 : f32 to vector<8x1xf32>
    %220 = arith.addf %212, %219 : vector<8x1xf32>
    %221 = arith.divf %66, %220 : vector<8x1xf32>
    %222 = math.log %221 : vector<8x1xf32>
    %cst_70 = arith.constant 0.000000e+00 : f32
    %223 = vector.broadcast %cst_70 : f32 to vector<8x1xf32>
    %224 = arith.subf %223, %222 : vector<8x1xf32>
    %cst_71 = arith.constant 9.99999993E-9 : f32
    %225 = vector.broadcast %cst_71 : f32 to vector<1x8xf32>
    %226 = arith.addf %218, %225 : vector<1x8xf32>
    %227 = arith.divf %71, %226 : vector<1x8xf32>
    %228 = math.log %227 : vector<1x8xf32>
    %cst_72 = arith.constant 0.000000e+00 : f32
    %229 = vector.broadcast %cst_72 : f32 to vector<1x8xf32>
    %230 = arith.subf %229, %228 : vector<1x8xf32>
    %231 = vector.shape_cast %224 : vector<8x1xf32> to vector<1x8x1xf32>
    %cst_73 = arith.constant dense<0.000000e+00> : vector<1xf32>
    %232 = vector.multi_reduction <add>, %231, %cst_73 [1, 2] : vector<1x8x1xf32> to vector<1xf32>
    %233 = vector.shape_cast %232 : vector<1xf32> to vector<1x1x1xf32>
    %234 = vector.extract %233[0, 0, 0] : f32 from vector<1x1x1xf32>
    %235 = vector.broadcast %234 : f32 to vector<1x1xf32>
    %236 = vector.shape_cast %230 : vector<1x8xf32> to vector<1x1x8xf32>
    %cst_74 = arith.constant dense<0.000000e+00> : vector<1xf32>
    %237 = vector.multi_reduction <add>, %236, %cst_74 [1, 2] : vector<1x1x8xf32> to vector<1xf32>
    %238 = vector.shape_cast %237 : vector<1xf32> to vector<1x1x1xf32>
    %239 = vector.extract %238[0, 0, 0] : f32 from vector<1x1x1xf32>
    %240 = vector.broadcast %239 : f32 to vector<1x1xf32>
    %241 = arith.addf %235, %240 : vector<1x1xf32>
    %cst_75 = arith.constant 1.600000e+01 : f32
    %242 = vector.broadcast %cst_75 : f32 to vector<1x1xf32>
    %243 = arith.divf %241, %242 : vector<1x1xf32>
    %c0_76 = arith.constant 0 : index
    %c0_77 = arith.constant 0 : index
    %244 = vector.load %arg4[%c0_76, %c0_77] : memref<1x1xf32, #tpu.memory_space<vmem>>, vector<1x1xf32>
    tpu.vector_store %arg4[%c0_76, %c0_77], %243 {strides = array<i32>} : memref<1x1xf32, #tpu.memory_space<vmem>>, vector<1x1xf32>,
    return
  }
}

</mosaic_0001>

<bundles_post_ra>
// kernel: ntxent_loss_pallas.1
= control target key start
LH: loop header
LB: loop body
LE: loop exit
PB: predicated region body
PF: predicated region fallthrough
CT: control target
= control target key end

     0   :  { %9 = vsyncpa [#allocation3], 0  ;;  %s1638_s0 = inlined_call_operand.hbm [shape: f32[8,32], index: 0, kind: input, shape index: {}]   ;;  %s1639_s1 = inlined_call_operand.hbm [shape: f32[8,32], index: 1, kind: input, shape index: {}]   ;;  %s1640_s2 = inlined_call_operand.hbm [shape: f32[8,32], index: 2, kind: input, shape index: {}]   ;;  %s1641_s3 = inlined_call_operand.vmem [shape: f32[8,32], index: 3, kind: input, shape index: {}]   ;;  %s1642_s4 = inlined_call_operand.hbm [shape: f32[1,1], index: 4, kind: output, shape index: {}]  }
   0x1   :  { %10 = vsyncpa [#allocation6], 0 }
   0x2   :  { %11 = vsyncpa [#allocation4], 0  ;;  %s1427_s15 = smov [#allocation5]   ;;  %s1428_s17 = smov [#allocation2]  }
   0x3   :  { %s28_s16 = sshll.u32 %s1427_s15, 4  ;;  %s18_s18 = sshll.u32 %s1428_s17, 4  ;;  %s29_s16 = int_to_ptr.vmem [resolvable:$true] %s28_s16  ;;  %s19_s18 = int_to_ptr.vmem [resolvable:$true] %s18_s18 }
   0x4   :  { %s1333_s21 = scalar_lea.hbm %s1639_s1, 128 }
   0x5   :  { %p1334_p0 = scmp.ne.s32.totalorder %s1639_s1, %s1333_s21  ;;  %p1337_p1 = scmp.lt.u32.totalorder %s1333_s21, %s1639_s1 }
   0x7   :  { %p1339_p2 = pnand %p1337_p1, %p1334_p0 }
   0x9   :  { %1342 = shalt.err (!%p1339_p2)
}
   0xa   :  { %s1343_s26 = scalar_lea.vmem %s29_s16, 128  ;;  %p1348_p4 = scmp.lt.s32.totalorder %s29_s16, %s29_s16 }
   0xb   :  { %p1344_p3 = scmp.ne.s32.totalorder %s29_s16, %s1343_s26  ;;  %p1349_p5 = scmp.lt.s32.totalorder %s1343_s26, %s1343_s26 }
   0xd   :  { %p1350_p6 = por %p1349_p5, %p1348_p4 }
   0xf   :  { %p1351_p7 = pnand %p1350_p6, %p1344_p3 }
  0x11   :  { %1354 = shalt.err (!%p1351_p7)
}
  0x12   :  { %31 = dma.hbm_to_vmem [thread:$0]  %s1639_s1, 128, %s29_s16, [#allocation6]  }
  0x13   :  { %s1355_s5 = scalar_lea.hbm %s1638_s0, 128 }
  0x14   :  { %p1356_p8 = scmp.ne.s32.totalorder %s1638_s0, %s1355_s5  ;;  %p1359_p9 = scmp.lt.u32.totalorder %s1355_s5, %s1638_s0 }
  0x16   :  { %p1361_p10 = pnand %p1359_p9, %p1356_p8 }
  0x18   :  { %1364 = shalt.err (!%p1361_p10)
}
  0x19   :  { %s1365_s10 = scalar_lea.vmem %s19_s18, 128  ;;  %p1370_p12 = scmp.lt.s32.totalorder %s19_s18, %s19_s18 }
  0x1a   :  { %p1366_p11 = scmp.ne.s32.totalorder %s19_s18, %s1365_s10  ;;  %p1371_p13 = scmp.lt.s32.totalorder %s1365_s10, %s1365_s10 }
  0x1c   :  { %p1372_p0 = por %p1371_p13, %p1370_p12 }
  0x1e   :  { %p1373_p1 = pnand %p1372_p0, %p1366_p11 }
  0x20   :  { %1376 = shalt.err (!%p1373_p1)
}
  0x21   :  { %21 = dma.hbm_to_vmem [thread:$0]  %s1638_s0, 128, %s19_s18, [#allocation3]  }
  0x22   :  { %s1429_s12 = smov [#allocation7]   ;;  %s1377_s16 = scalar_lea.hbm %s1640_s2, 128 }
  0x23   :  { %s38_s13 = sshll.u32 %s1429_s12, 4  ;;  %p1378_p2 = scmp.ne.s32.totalorder %s1640_s2, %s1377_s16  ;;  %s39_s13 = int_to_ptr.vmem [resolvable:$true] %s38_s13 }
  0x24   :  { %p1381_p3 = scmp.lt.u32.totalorder %s1377_s16, %s1640_s2 }
  0x26   :  { %p1383_p4 = pnand %p1381_p3, %p1378_p2 }
  0x28   :  { %1386 = shalt.err (!%p1383_p4)
}
  0x29   :  { %s1387_s22 = scalar_lea.vmem %s39_s13, 128  ;;  %p1392_p6 = scmp.lt.s32.totalorder %s39_s13, %s39_s13 }
  0x2a   :  { %p1388_p5 = scmp.ne.s32.totalorder %s39_s13, %s1387_s22  ;;  %p1393_p7 = scmp.lt.s32.totalorder %s1387_s22, %s1387_s22 }
  0x2c   :  { %p1394_p8 = por %p1393_p7, %p1392_p6 }
  0x2e   :  { %p1395_p9 = pnand %p1394_p8, %p1388_p5 }
  0x30   :  { %1398 = shalt.err (!%p1395_p9)
}
  0x31   :  { %41 = dma.hbm_to_vmem [thread:$0]  %s1640_s2, 128, %s39_s13, [#allocation6]  }
  0x32   :  { %1421 = dma.done.wait [#allocation3], 128  }
  0x33   :  { %1422 = vsyncadd [#allocation3], 4294967168 }
  0x34   :  { %1423 = dma.done.wait [#allocation6], 256  }
  0x35   :  { %1424 = vsyncadd [#allocation6], 4294967040  ;;  %vm55_vm0 = vcmask 261120   ;;  %v1494_v0 = vld [vmem:[#allocation7] sm:$0xff]  ;;  %v1496_v1 = vld [vmem:[#allocation5] sm:$0xff]  ;;  %v1430_v12 = vmov 0.0  }
  0x36   :  { %v1501_v2 = vld [vmem:[%s1641_s3] sm:$0xff]  ;;  %v85_v3 = vmul.f32 %v1494_v0, %v1494_v0  ;;  %v70_v4 = vmul.f32 %v1496_v1, %v1496_v1  ;;  %1220 = vmatprep.subr.mxu0 %v1430_v12  ;;  %1225 = vmatprep.subr.mxu1 %v1430_v12  ;;  %vm1431_vm1 = vmmov 0   ;;  %vm422_vm11 = vcmask 64512   ;;  %s1432_s25 = smov [#allocation8]  }
  0x37   :  { %v100_v5 = vmul.f32 %v1501_v2, %v1501_v2  ;;  %v1509_v6 = vld [vmem:[#allocation2] sm:$0xff]  ;;  %1222 = vmatprep.mubr.msk.f32.mxu0 %vm1431_vm1, %v1430_v12  ;;  %1227 = vmatprep.mubr.msk.f32.mxu1 %vm1431_vm1, %v1430_v12  ;;  %vm1142_vm12 = vcmask 57344   ;;  %vm1130_vm13 = vcmask 7168   ;;  %s1165_s26 = sshll.u32 %s1432_s25, 4  ;;  %vm1157_vm14 = vcmask 0   ;;  %s1166_s26 = int_to_ptr.vmem [resolvable:$true] %s1165_s26 }
  0x38   :  { %v54_v7 = vmul.f32 %v1509_v6, %v1509_v6  ;;  %v86_v8 = vsel %vm55_vm0, %v85_v3, 0.0  ;;  %v71_v9 = vsel %vm55_vm0, %v70_v4, 0.0  ;;  %s1399_s27 = scalar_lea.vmem %s1166_s26, 16  ;;  %s1403_s28 = scalar_lea.vmem %s1166_s26, 32 }
  0x39   :  { %87 = vadd.xlane.f32.xlu1 %v86_v8  ;;  %72 = vadd.xlane.f32.xlu0 %v71_v9  ;;  %v101_v10 = vsel %vm55_vm0, %v100_v5, 0.0  ;;  %p1400_p10 = scmp.ne.s32.totalorder %s1166_s26, %s1399_s27  ;;  %p1404_p11 = scmp.lt.s32.totalorder %s1166_s26, %s1166_s26 }
  0x3a   :  { %v56_v11 = vsel %vm55_vm0, %v54_v7, 0.0  ;;  %p1405_p12 = scmp.lt.s32.totalorder %s1403_s28, %s1399_s27 }
  0x3c   :  { %p1406_p13 = por %p1405_p12, %p1404_p11 }
  0x3d   :  { %102 = vadd.xlane.f32.xlu0 %v101_v10  ;;  %57 = vadd.xlane.f32.xlu1 %v56_v11 }
  0x3e   :  { %p1407_p0 = pnand %p1406_p13, %p1400_p10 }
  0xc6   :  { %v88_v13 = vpop.xlane.xlu1 %87  ;;  %v73_v14 = vpop.xlane.xlu0 %72 }
  0xc7   :  { %1285 = vrsqrt.f32 %v88_v13  ;;  %vm91_vm2 = vcmp.eq.f32.partialorder %v88_v13, inf  ;;  %v94_v20 = vand.u32 2147483648, %v88_v13  ;;  %vm93_vm3 = vcmp.eq.f32.partialorder %v88_v13, 0.0 }
  0xc8   :  { %1287 = vrsqrt.f32 %v73_v14  ;;  %vm76_vm4 = vcmp.eq.f32.partialorder %v73_v14, inf  ;;  %v79_v23 = vand.u32 2147483648, %v73_v14  ;;  %vm78_vm5 = vcmp.eq.f32.partialorder %v73_v14, 0.0 }
  0xca   :  { %v103_v15 = vpop.xlane.xlu0 %102  ;;  %v58_v16 = vpop.xlane.xlu1 %57 }
  0xcb   :  { %1289 = vrsqrt.f32 %v103_v15  ;;  %vm106_vm6 = vcmp.eq.f32.partialorder %v103_v15, inf  ;;  %vm108_vm7 = vcmp.eq.f32.partialorder %v103_v15, 0.0  ;;  %v109_v32 = vand.u32 2147483648, %v103_v15 }
  0xcc   :  { %1291 = vrsqrt.f32 %v58_v16  ;;  %vm61_vm8 = vcmp.eq.f32.partialorder %v58_v16, inf  ;;  %v64_v35 = vand.u32 2147483648, %v58_v16  ;;  %vm63_vm9 = vcmp.eq.f32.partialorder %v58_v16, 0.0 }
  0xd1   :  { %v1286_v17 = vpop.eup %1285 }
  0xd2   :  { %v1288_v18 = vpop.eup %1287  ;;  %v90_v19 = vmul.f32 %v1286_v17, %v88_v13 }
  0xd3   :  { %v75_v21 = vmul.f32 %v1288_v18, %v73_v14 }
  0xd4   :  { %v92_v22 = vsel %vm91_vm2, %v88_v13, %v90_v19 }
  0xd5   :  { %v1290_v24 = vpop.eup %1289  ;;  %v95_v25 = vsel %vm93_vm3, %v94_v20, %v92_v22  ;;  %v77_v26 = vsel %vm76_vm4, %v73_v14, %v75_v21 }
  0xd6   :  { %v1292_v27 = vpop.eup %1291  ;;  %v96_v28 = vmax.f32 %v95_v25, 1e-12  ;;  %v80_v29 = vsel %vm78_vm5, %v79_v23, %v77_v26  ;;  %v105_v30 = vmul.f32 %v1290_v24, %v103_v15 }
  0xd7   :  { %v81_v31 = vmax.f32 %v80_v29, 1e-12  ;;  %v60_v33 = vmul.f32 %v1292_v27, %v58_v16 }
  0xd8   :  { %1293 = vrcp.f32 %v96_v28  ;;  %v107_v34 = vsel %vm106_vm6, %v103_v15, %v105_v30  ;;  %v115_v15 = vlaneseq }
  0xd9   :  { %v110_v36 = vsel %vm108_vm7, %v109_v32, %v107_v34  ;;  %v62_v37 = vsel %vm61_vm8, %v58_v16, %v60_v33  ;;  %1295 = vrcp.f32 %v81_v31 }
  0xda   :  { %v111_v38 = vmax.f32 %v110_v36, 1e-12  ;;  %v65_v39 = vsel %vm63_vm9, %v64_v35, %v62_v37  ;;  %v116_v23 = vshrl.u32 %v115_v15, 7  ;;  %v118_v24 = vand.u32 127, %v115_v15 }
  0xdb   :  { %v66_v40 = vmax.f32 %v65_v39, 1e-12 }
  0xdc   :  { %1297 = vrcp.f32 %v111_v38  ;;  %vm119_vm10 = vcmp.eq.s32.totalorder %v116_v23, %v118_v24 }
  0xdd   :  { %1299 = vrcp.f32 %v66_v40  ;;  %v1580_v34 = vsel %vm119_vm10, 1.0, %v1430_v12 }
  0xe2   :  { %v1294_v41 = vpop.eup %1293 }
  0xe3   :  { %v98_v42 = vmul.f32 %v1294_v41, %v1494_v0  ;;  %v1296_v43 = vpop.eup %1295 }
  0xe4   :  { %v83_v47 = vmul.f32 %v1296_v43, %v1496_v1 }
  0xe5   :  { %v486_v44 = vrot.slane %v98_v42, 7 }
  0xe6   :  { %v1298_v45 = vpop.eup %1297 }
  0xe7   :  { %v1300_v46 = vpop.eup %1299  ;;  %v113_v48 = vmul.f32 %v1298_v45, %v1501_v2  ;;  %v573_v49 = vrot.slane %v486_v44, 7  ;;  %v487_v55 = vmul.f32 0.1, %v486_v44 }
  0xe8   :  { %v68_v50 = vmul.f32 %v1300_v46, %v1509_v6 }
  0xe9   :  { %v114_v51 = vadd.f32 %v113_v48, %v83_v47  ;;  %v660_v52 = vrot.slane %v573_v49, 7  ;;  %v574_v56 = vmul.f32 0.1, %v573_v49 }
  0xea   :  { %v343_v54 = vadd.f32 %v98_v42, %v68_v50  ;;  %v488_v59 = vadd.f32 %v487_v55, %v68_v50 }
  0xeb   :  { %1221 = vmatpush3.xpose.msk.msra.mxu0 %vm55_vm0, %v114_v51  ;;  %1226 = vmatpush3.xpose.msk.msra.mxu1 %vm55_vm0, %v114_v51  ;;  %v747_v53 = vrot.slane %v660_v52, 7  ;;  %v661_v58 = vmul.f32 0.1, %v660_v52  ;;  %v575_v60 = vadd.f32 %v574_v56, %v68_v50 }
  0xec   :  { %1230 = vmatprep.subr.mxu0 %v1430_v12  ;;  %1235 = vmatprep.subr.mxu1 %v1430_v12 }
  0xed   :  { %v834_v57 = vrot.slane %v747_v53, 7  ;;  %v748_v61 = vmul.f32 0.1, %v747_v53  ;;  %v662_v63 = vadd.f32 %v661_v58, %v68_v50 }
  0xee   :  { %1223 = vmatmul.mubr.msk.f32.vlgmr.msra.gmra.mrb[0].mxu0 %vm55_vm0, %v68_v50  ;;  %1228 = vmatmul.mubr.msk.f32.vlgmr.msra.gmra.mrb[0].mxu1 %vm55_vm0, %v98_v42 }
  0xef   :  { %1231 = vmatpush3.xpose.msk.msra.mxu0 %vm55_vm0, %v114_v51  ;;  %1236 = vmatpush3.xpose.msk.msra.mxu1 %vm55_vm0, %v343_v54  ;;  %v921_v62 = vrot.slane %v834_v57, 7  ;;  %v749_v0 = vadd.f32 %v748_v61, %v68_v50  ;;  %v835_v1 = vmul.f32 0.1, %v834_v57 }
  0xf0   :  { %1232 = vmatprep.mubr.msk.f32.mxu0 %vm1431_vm1, %v1430_v12  ;;  %1237 = vmatprep.mubr.msk.f32.mxu1 %vm1431_vm1, %v1430_v12 }
  0xf1   :  { %1240 = vmatprep.subr.mxu0 %v1430_v12  ;;  %1245 = vmatprep.subr.mxu1 %v1430_v12  ;;  %v922_v2 = vmul.f32 0.1, %v921_v62  ;;  %v1008_v3 = vrot.slane %v921_v62, 7  ;;  %v836_v4 = vadd.f32 %v835_v1, %v68_v50 }
  0xf2   :  { %1233 = vmatmul.mubr.msk.f32.vlgmr.msra.gmra.mrb[2].mxu0 %vm55_vm0, %v114_v51  ;;  %1238 = vmatmul.mubr.msk.f32.vlgmr.msra.gmra.mrb[2].mxu1 %vm55_vm0, %v343_v54 }
  0xf3   :  { %1241 = vmatpush3.xpose.msk.msra.mxu0 %vm55_vm0, %v488_v59  ;;  %1246 = vmatpush3.xpose.msk.msra.mxu1 %vm55_vm0, %v575_v60  ;;  %v923_v5 = vadd.f32 %v922_v2, %v68_v50  ;;  %v1009_v6 = vmul.f32 0.1, %v1008_v3 }
  0xf4   :  { %1242 = vmatprep.mubr.msk.f32.mxu0 %vm1431_vm1, %v1430_v12  ;;  %1247 = vmatprep.mubr.msk.f32.mxu1 %vm1431_vm1, %v1430_v12 }
  0xf5   :  { %1250 = vmatprep.subr.mxu0 %v1430_v12  ;;  %1255 = vmatprep.subr.mxu1 %v1430_v12  ;;  %v1010_v7 = vadd.f32 %v1009_v6, %v68_v50 }
  0xf6   :  { %1243 = vmatmul.mubr.msk.f32.vlgmr.msra.gmra.mrb[4].mxu0 %vm55_vm0, %v488_v59  ;;  %1248 = vmatmul.mubr.msk.f32.vlgmr.msra.gmra.mrb[4].mxu1 %vm55_vm0, %v575_v60 }
  0xf7   :  { %1251 = vmatpush3.xpose.msk.msra.mxu0 %vm55_vm0, %v662_v63  ;;  %1256 = vmatpush3.xpose.msk.msra.mxu1 %vm55_vm0, %v749_v0 }
  0xf8   :  { %1252 = vmatprep.mubr.msk.f32.mxu0 %vm1431_vm1, %v1430_v12  ;;  %1257 = vmatprep.mubr.msk.f32.mxu1 %vm1431_vm1, %v1430_v12 }
  0xf9   :  { %1260 = vmatprep.subr.mxu0 %v1430_v12  ;;  %1265 = vmatprep.subr.mxu1 %v1430_v12 }
  0xfa   :  { %1253 = vmatmul.mubr.msk.f32.vlgmr.msra.gmra.mrb[6].mxu0 %vm55_vm0, %v662_v63  ;;  %1258 = vmatmul.mubr.msk.f32.vlgmr.msra.gmra.mrb[6].mxu1 %vm55_vm0, %v749_v0 }
  0xfb   :  { %1261 = vmatpush3.xpose.msk.msra.mxu0 %vm55_vm0, %v836_v4  ;;  %1266 = vmatpush3.xpose.msk.msra.mxu1 %vm55_vm0, %v923_v5 }
  0xfc   :  { %1262 = vmatprep.mubr.msk.f32.mxu0 %vm1431_vm1, %v1430_v12  ;;  %1267 = vmatprep.mubr.msk.f32.mxu1 %vm1431_vm1, %v1430_v12 }
  0xfd   :  { %1270 = vmatprep.subr.mxu0 %v1430_v12 }
  0xfe   :  { %1263 = vmatmul.mubr.msk.f32.vlgmr.msra.gmra.mrb[8].mxu0 %vm55_vm0, %v836_v4  ;;  %1268 = vmatmul.mubr.msk.f32.vlgmr.msra.gmra.mrb[8].mxu1 %vm55_vm0, %v923_v5 }
  0xff   :  { %1271 = vmatpush3.xpose.msk.msra.mxu0 %vm55_vm0, %v1010_v7  ;;  %1272 = vmatprep.mubr.msk.f32.mxu0 %vm1431_vm1, %v1430_v12 }
 0x102   :  { %1273 = vmatmul.mubr.msk.f32.vlgmr.msra.gmra.mrb[10].mxu0 %vm55_vm0, %v1010_v7 }
 0x1c1   :  { %v1576_v8 = vpop.f32.mrb[0].mxu0  ;;  %v267_v9 = vpop.f32.mrb[0].mxu1 }
 0x1c2   :  { %v419_v10 = vadd.f32 %v267_v9, %v1576_v8  ;;  %v455_v11 = vmul.f32 0.1, %v267_v9  ;;  %v1224_v13 = vpop.f32.mrb[1].mxu0  ;;  %v1229_v14 = vpop.f32.mrb[1].mxu1  ;;  %v453_v59 = vmul.f32 1.442695, %v1576_v8 }
 0x1c4   :  { %v420_v16 = vmul.f32 1.442695, %v419_v10  ;;  %v456_v19 = vmul.f32 1.442695, %v455_v11 }
 0x1c5   :  { %v337_v17 = vpop.f32.mrb[2].mxu0  ;;  %v413_v18 = vpop.f32.mrb[2].mxu1 }
 0x1c6   :  { %1301 = vpow2.f32 %v420_v16  ;;  %v417_v20 = vmul.f32 1.442695, %v413_v18  ;;  %v1234_v21 = vpop.f32.mrb[3].mxu0  ;;  %v1239_v22 = vpop.f32.mrb[3].mxu1  ;;  %v341_v25 = vmul.f32 1.442695, %v337_v17 }
 0x1c8   :  { %1303 = vpow2.f32 %v417_v20 }
 0x1c9   :  { %v558_v26 = vpop.f32.mrb[4].mxu0  ;;  %v645_v27 = vpop.f32.mrb[4].mxu1  ;;  %1305 = vpow2.f32 %v456_v19 }
 0x1ca   :  { %v562_v28 = vmul.f32 1.442695, %v558_v26  ;;  %v649_v29 = vmul.f32 1.442695, %v645_v27  ;;  %v1244_v30 = vpop.f32.mrb[5].mxu0  ;;  %v1249_v31 = vpop.f32.mrb[5].mxu1  ;;  %1307 = vpow2.f32 %v341_v25 }
 0x1cc   :  { %1309 = vpow2.f32 %v562_v28 }
 0x1cd   :  { %v732_v32 = vpop.f32.mrb[6].mxu0  ;;  %v819_v33 = vpop.f32.mrb[6].mxu1  ;;  %1311 = vpow2.f32 %v649_v29 }
 0x1ce   :  { %v736_v35 = vmul.f32 1.442695, %v732_v32  ;;  %v1254_v36 = vpop.f32.mrb[7].mxu0  ;;  %v1259_v37 = vpop.f32.mrb[7].mxu1  ;;  %v823_v43 = vmul.f32 1.442695, %v819_v33 }
 0x1d0   :  { %v1302_v38 = vpop.eup %1301  ;;  %1313 = vpow2.f32 %v736_v35 }
 0x1d1   :  { %v906_v39 = vpop.f32.mrb[8].mxu0  ;;  %v993_v40 = vpop.f32.mrb[8].mxu1  ;;  %v1583_v41 = vsel %vm422_vm11, %v1302_v38, 0.0  ;;  %v433_v42 = vmul.f32 %v1302_v38, %v1580_v34  ;;  %1315 = vpow2.f32 %v823_v43 }
 0x1d2   :  { %v1269_v44 = vpop.f32.mrb[9].mxu1  ;;  %431 = vadd.xlane.f32.xlu0 %v1583_v41  ;;  %v1304_v12 = vpop.eup %1303  ;;  %v910_v53 = vmul.f32 1.442695, %v906_v39  ;;  %v997_v62 = vmul.f32 1.442695, %v993_v40  ;;  %v437_v23 = vrot.slane %v1583_v41, 4 }
 0x1d3   :  { %v1264_v45 = vpop.f32.mrb[9].mxu0  ;;  %v434_v46 = vsel %vm422_vm11, %v433_v42, 0.0  ;;  %v1588_v47 = vpop.eup %1305  ;;  %v423_v50 = vsel %vm422_vm11, %v1304_v12, 0.0  ;;  %v426_v51 = vmul.f32 %v1304_v12, %v1580_v34 }
 0x1d4   :  { %435 = vadd.xlane.f32.xlu1 %v434_v46  ;;  %v1308_v48 = vpop.eup %1307  ;;  %v458_v58 = vsel %vm422_vm11, %v1588_v47, 0.0  ;;  %1317 = vpow2.f32 %v910_v53  ;;  %v443_v17 = vrot.slane %v434_v46, 4  ;;  %v438_v35 = vadd.f32 %v437_v23, %v1583_v41 }
 0x1d5   :  { %v1080_v49 = vpop.f32.mrb[10].mxu0  ;;  %v427_v55 = vsel %vm422_vm11, %v426_v51, 0.0  ;;  %v1102_v60 = vmul.f32 %v1308_v48, %v1580_v34  ;;  %v459_v1 = vrot.slane %v458_v58, 4  ;;  %1319 = vpow2.f32 %v453_v59 }
 0x1d6   :  { %v1310_v52 = vpop.eup %1309  ;;  %424 = vadd.xlane.f32.xlu0 %v423_v50  ;;  %v1274_v54 = vpop.f32.mrb[11].mxu0  ;;  %v1084_v3 = vmul.f32 1.442695, %v1080_v49  ;;  %1321 = vpow2.f32 %v997_v62  ;;  %v1095_v7 = vsel %vm422_vm11, %v1308_v48, 0.0  ;;  %v444_v27 = vadd.f32 %v443_v17, %v434_v46 }
 0x1d7   :  { %v567_v56 = vmul.f32 %v1310_v52, %v1580_v34  ;;  %v1312_v57 = vpop.eup %1311  ;;  %v564_v61 = vsel %vm422_vm11, %v1310_v52, 0.0  ;;  %v1103_v4 = vsel %vm422_vm11, %v1102_v60, 0.0  ;;  %v460_v6 = vadd.f32 %v459_v1, %v458_v58 }
 0x1d8   :  { %428 = vadd.xlane.f32.xlu1 %v427_v55  ;;  %v654_v0 = vmul.f32 %v1312_v57, %v1580_v34  ;;  %v651_v5 = vsel %vm422_vm11, %v1312_v57, 0.0  ;;  %v1104_v13 = vrot.slane %v1103_v4, 4  ;;  %1323 = vpow2.f32 %v1084_v3 }
 0x1d9   :  { %v568_v63 = vsel %vm422_vm11, %v567_v56, 0.0  ;;  %v461_v10 = vrot.slane %v460_v6, 2  ;;  %v1096_v16 = vrot.slane %v1095_v7, 4  ;;  %v445_v40 = vrot.slane %v444_v27, 2 }
 0x1da   :  { %565 = vadd.xlane.f32.xlu0 %v564_v61  ;;  %v1314_v2 = vpop.eup %1313  ;;  %v655_v8 = vsel %vm422_vm11, %v654_v0, 0.0  ;;  %v1105_v22 = vadd.f32 %v1104_v13, %v1103_v4  ;;  %v439_v46 = vrot.slane %v438_v35, 2 }
 0x1db   :  { %v741_v9 = vmul.f32 %v1314_v2, %v1580_v34  ;;  %v1316_v11 = vpop.eup %1315  ;;  %v738_v14 = vsel %vm422_vm11, %v1314_v2, 0.0  ;;  %v462_v15 = vadd.f32 %v461_v10, %v460_v6  ;;  %v1097_v26 = vadd.f32 %v1096_v16, %v1095_v7 }
 0x1dc   :  { %569 = vadd.xlane.f32.xlu1 %v568_v63  ;;  %v828_v19 = vmul.f32 %v1316_v11, %v1580_v34  ;;  %v825_v24 = vsel %vm422_vm11, %v1316_v11, 0.0  ;;  %v1106_v33 = vrot.slane %v1105_v22, 2  ;;  %v446_v51 = vadd.f32 %v445_v40, %v444_v27 }
 0x1dd   :  { %v742_v18 = vsel %vm422_vm11, %v741_v9, 0.0  ;;  %v463_v20 = vrot.slane %v462_v15, 1  ;;  %v1098_v39 = vrot.slane %v1097_v26, 2  ;;  %v440_v56 = vadd.f32 %v439_v46, %v438_v35 }
 0x1de   :  { %652 = vadd.xlane.f32.xlu0 %v651_v5  ;;  %v1318_v21 = vpop.eup %1317  ;;  %v829_v29 = vsel %vm422_vm11, %v828_v19, 0.0  ;;  %v1107_v45 = vadd.f32 %v1106_v33, %v1105_v22  ;;  %v447_v61 = vrot.slane %v446_v51, 1 }
 0x1df   :  { %v464_v25 = vadd.f32 %v463_v20, %v462_v15  ;;  %v1320_v28 = vpop.eup %1319  ;;  %v915_v30 = vmul.f32 %v1318_v21, %v1580_v34  ;;  %v912_v36 = vsel %vm422_vm11, %v1318_v21, 0.0  ;;  %v1099_v50 = vadd.f32 %v1098_v39, %v1097_v26 }
 0x1e0   :  { %656 = vadd.xlane.f32.xlu1 %v655_v8  ;;  %v1322_v32 = vpop.eup %1321  ;;  %v1108_v55 = vrot.slane %v1107_v45, 1  ;;  %v441_v0 = vrot.slane %v440_v56, 1  ;;  %v448_v5 = vadd.f32 %v447_v61, %v446_v51 }
 0x1e1   :  { %v465_v31 = vsub.f32 %v464_v25, %v1588_v47  ;;  %v916_v42 = vsel %vm422_vm11, %v915_v30, 0.0  ;;  %v1002_v43 = vmul.f32 %v1322_v32, %v1580_v34  ;;  %v999_v47 = vsel %vm422_vm11, %v1322_v32, 0.0 }
 0x1e2   :  { %739 = vadd.xlane.f32.xlu0 %v738_v14  ;;  %v1324_v38 = vpop.eup %1323  ;;  %v1100_v60 = vrot.slane %v1099_v50, 1  ;;  %v1109_v3 = vadd.f32 %v1108_v55, %v1107_v45  ;;  %v442_v7 = vadd.f32 %v441_v0, %v440_v56 }
 0x1e3   :  { %v466_v37 = vmul.f32 %v1320_v28, %v465_v31  ;;  %v1089_v48 = vmul.f32 %v1324_v38, %v1580_v34  ;;  %v1003_v54 = vsel %vm422_vm11, %v1002_v43, 0.0  ;;  %v1086_v63 = vsel %vm422_vm11, %v1324_v38, 0.0 }
 0x1e4   :  { %743 = vadd.xlane.f32.xlu1 %v742_v18  ;;  %v1101_v4 = vadd.f32 %v1100_v60, %v1099_v50  ;;  %v452_v11 = vsub.f32 %v442_v7, %v448_v5 }
 0x1e5   :  { %v467_v44 = vsel %vm422_vm11, %v466_v37, 0.0  ;;  %v470_v12 = vmul.f32 %v1580_v34, %v466_v37  ;;  %v1090_v59 = vsel %vm422_vm11, %v1089_v48, 0.0 }
 0x1e6   :  { %826 = vadd.xlane.f32.xlu0 %v825_v24  ;;  %v474_v41 = vrot.slane %v467_v44, 4  ;;  %v1115_v10 = vsub.f32 %v1101_v4, %v1109_v3 }
 0x1e7   :  { %v471_v49 = vsel %vm422_vm11, %v470_v12, 0.0 }
 0x1e8   :  { %830 = vadd.xlane.f32.xlu1 %v829_v29  ;;  %v475_v52 = vadd.f32 %v474_v41, %v467_v44  ;;  %v480_v53 = vrot.slane %v471_v49, 4  ;;  %v1116_v15 = vmul.f32 8.0, %v1115_v10 }
 0x1ea   :  { %913 = vadd.xlane.f32.xlu0 %v912_v36  ;;  %v476_v57 = vrot.slane %v475_v52, 2  ;;  %v481_v58 = vadd.f32 %v480_v53, %v471_v49 }
 0x1ec   :  { %917 = vadd.xlane.f32.xlu1 %v916_v42  ;;  %v477_v34 = vadd.f32 %v476_v57, %v475_v52  ;;  %v482_v62 = vrot.slane %v481_v58, 2 }
 0x1ee   :  { %1000 = vadd.xlane.f32.xlu0 %v999_v47  ;;  %v478_v1 = vrot.slane %v477_v34, 1  ;;  %v483_v2 = vadd.f32 %v482_v62, %v481_v58 }
 0x1f0   :  { %1004 = vadd.xlane.f32.xlu1 %v1003_v54  ;;  %v484_v6 = vrot.slane %v483_v2, 1  ;;  %v479_v8 = vadd.f32 %v478_v1, %v477_v34 }
 0x1f2   :  { %1091 = vadd.xlane.f32.xlu0 %v1090_v59  ;;  %v485_v9 = vadd.f32 %v484_v6, %v483_v2 }
 0x1f4   :  { %1087 = vadd.xlane.f32.xlu1 %v1086_v63  ;;  %v1113_v13 = vsub.f32 %v479_v8, %v485_v9 }
 0x1f6   :  { %468 = vadd.xlane.f32.xlu0 %v467_v44  ;;  %v1114_v14 = vadd.f32 %v1113_v13, %v452_v11 }
 0x1f8   :  { %472 = vadd.xlane.f32.xlu1 %v471_v49  ;;  %v1117_v16 = vadd.f32 %v1116_v15, %v1114_v14 }
 0x1fa   :  { %v1124_v17 = vadd.f32 1e-08, %v1117_v16 }
 0x1fc   :  { %1325 = vrcp.f32 %v1124_v17 }
 0x206   :  { %v1326_v18 = vpop.eup %1325 }
 0x207   :  { %v1126_v19 = vmul.f32 %v1326_v18, %v448_v5 }
 0x209   :  { %1327 = vlog2.f32 %v1126_v19 }
 0x213   :  { %v1328_v20 = vpop.eup %1327 }
 0x214   :  { %v1128_v21 = vmul.f32 0.6931472, %v1328_v20 }
 0x216   :  { %v1129_v22 = vsub.f32 0.0, %v1128_v21 }
 0x218   :  { %v1143_v23 = vsel %vm1142_vm12, %v1129_v22, 0.0 }
 0x219   :  { %1144 = vadd.xlane.f32.xlu1 %v1143_v23 }
 0x25f   :  { %v432_v24 = vpop.xlane.xlu0 %431 }
 0x261   :  { %v436_v25 = vpop.xlane.xlu1 %435 }
 0x263   :  { %v425_v26 = vpop.xlane.xlu0 %424 }
 0x265   :  { %v429_v27 = vpop.xlane.xlu1 %428 }
 0x266   :  { %v449_v45 = vsub.f32 %v425_v26, %v429_v27 }
 0x267   :  { %v566_v28 = vpop.xlane.xlu0 %565 }
 0x268   :  { %v450_v51 = vadd.f32 %v449_v45, %v432_v24 }
 0x269   :  { %v570_v29 = vpop.xlane.xlu1 %569 }
 0x26a   :  { %v571_v39 = vsub.f32 %v566_v28, %v570_v29  ;;  %v451_v56 = vsub.f32 %v450_v51, %v436_v25 }
 0x26b   :  { %v653_v30 = vpop.xlane.xlu0 %652 }
 0x26d   :  { %v657_v31 = vpop.xlane.xlu1 %656 }
 0x26e   :  { %v658_v37 = vsub.f32 %v653_v30, %v657_v31 }
 0x26f   :  { %v740_v32 = vpop.xlane.xlu0 %739 }
 0x270   :  { %v659_v43 = vadd.f32 %v658_v37, %v571_v39 }
 0x271   :  { %v744_v33 = vpop.xlane.xlu1 %743 }
 0x272   :  { %v745_v40 = vsub.f32 %v740_v32, %v744_v33 }
 0x273   :  { %v827_v35 = vpop.xlane.xlu0 %826 }
 0x274   :  { %v746_v46 = vadd.f32 %v745_v40, %v659_v43 }
 0x275   :  { %v831_v36 = vpop.xlane.xlu1 %830 }
 0x276   :  { %v832_v44 = vsub.f32 %v827_v35, %v831_v36 }
 0x277   :  { %v914_v38 = vpop.xlane.xlu0 %913 }
 0x278   :  { %v833_v48 = vadd.f32 %v832_v44, %v746_v46 }
 0x279   :  { %v918_v42 = vpop.xlane.xlu1 %917 }
 0x27a   :  { %v919_v41 = vsub.f32 %v914_v38, %v918_v42 }
 0x27b   :  { %v1001_v12 = vpop.xlane.xlu0 %1000 }
 0x27c   :  { %v920_v52 = vadd.f32 %v919_v41, %v833_v48 }
 0x27d   :  { %v1005_v47 = vpop.xlane.xlu1 %1004 }
 0x27e   :  { %v1006_v49 = vsub.f32 %v1001_v12, %v1005_v47 }
 0x27f   :  { %v1092_v50 = vpop.xlane.xlu0 %1091 }
 0x280   :  { %v1007_v54 = vadd.f32 %v1006_v49, %v920_v52 }
 0x281   :  { %v1088_v53 = vpop.xlane.xlu1 %1087 }
 0x282   :  { %v1093_v55 = vsub.f32 %v1088_v53, %v1092_v50 }
 0x283   :  { %v469_v58 = vpop.xlane.xlu0 %468 }
 0x284   :  { %v1094_v57 = vadd.f32 %v1093_v55, %v1007_v54 }
 0x285   :  { %v473_v59 = vpop.xlane.xlu1 %472 }
 0x286   :  { %v1110_v60 = vadd.f32 %v1094_v57, %v451_v56  ;;  %v1111_v61 = vsub.f32 %v469_v58, %v473_v59 }
 0x288   :  { %v1112_v34 = vadd.f32 %v1111_v61, %v1110_v60 }
 0x28a   :  { %v1118_v62 = vadd.f32 1e-08, %v1112_v34 }
 0x28c   :  { %1329 = vrcp.f32 %v1118_v62 }
 0x296   :  { %v1330_v63 = vpop.eup %1329 }
 0x297   :  { %v1120_v0 = vmul.f32 %v1330_v63, %v436_v25 }
 0x299   :  { %1331 = vlog2.f32 %v1120_v0 }
 0x2a3   :  { %v1332_v1 = vpop.eup %1331 }
 0x2a4   :  { %v1122_v2 = vmul.f32 0.6931472, %v1332_v1 }
 0x2a6   :  { %v1123_v3 = vsub.f32 0.0, %v1122_v2  ;;  %v1145_v5 = vpop.xlane.xlu1 %1144 }
 0x2a7   :  { %v1146_v6 = vrot.slane %v1145_v5, 4 }
 0x2a8   :  { %v1131_v4 = vsel %vm1130_vm13, %v1123_v3, 0.0 }
 0x2a9   :  { %1132 = vadd.xlane.f32.xlu0 %v1131_v4  ;;  %v1147_v7 = vadd.f32 %v1146_v6, %v1145_v5 }
 0x2ab   :  { %v1148_v8 = vrot.slane %v1147_v7, 2 }
 0x2ad   :  { %v1149_v13 = vadd.f32 %v1148_v8, %v1147_v7 }
 0x2af   :  { %v1150_v16 = vrot.slane %v1149_v13, 1 }
 0x2b1   :  { %v1151_v19 = vadd.f32 %v1150_v16, %v1149_v13 }
 0x336   :  { %v1133_v9 = vpop.xlane.xlu0 %1132 }
 0x337   :  { %v1134_v10 = vrot.slane %v1133_v9, 4 }
 0x339   :  { %v1135_v11 = vadd.f32 %v1134_v10, %v1133_v9 }
 0x33b   :  { %v1136_v14 = vrot.slane %v1135_v11, 2 }
 0x33d   :  { %v1137_v15 = vadd.f32 %v1136_v14, %v1135_v11 }
 0x33f   :  { %v1138_v17 = vrot.slane %v1137_v15, 1 }
 0x341   :  { %v1139_v18 = vadd.f32 %v1138_v17, %v1137_v15 }
 0x343   :  { %1275 = vpush %v1139_v18 }
 0x344   :  { %1277 = vpush %v1151_v19 }
 0x374   :  { %s1276_s2 = spop %1275 }
 0x375   :  { %v1141_v20 = vstv %s1276_s2  ;;  %s1278_s3 = spop %1277 }
 0x376   :  { %v1153_v21 = vstv %s1278_s3 }
 0x377   :  { %v1154_v22 = vadd.f32 %v1153_v21, %v1141_v20 }
 0x379   :  { %v1156_v23 = vmul.f32 0.0625, %v1154_v22 }
 0x37b   :  { %1158 = vst.msk [vmem:[#allocation8] sm:$0x1] %vm1157_vm14, %v1156_v23 }
 0x37c   :  { %1410 = shalt.err (!%p1407_p0)
}
 0x37d   :  { %s1411_s5 = scalar_lea.hbm %s1642_s4, 16 }
 0x37e   :  { %p1412_p1 = scmp.ne.s32.totalorder %s1642_s4, %s1411_s5  ;;  %p1415_p2 = scmp.lt.u32.totalorder %s1411_s5, %s1642_s4 }
 0x380   :  { %p1417_p3 = pnand %p1415_p2, %p1412_p1 }
 0x382   :  { %1420 = shalt.err (!%p1417_p3)
}
 0x383   :  { %1168 = dma.vmem_to_hbm [thread:$0]  %s1166_s26, 16, %s1642_s4, [#allocation4]  }
 0x384   :  { %1425 = dma.done.wait [#allocation4], 16  }
 0x385   :  { %1426 = vsyncadd [#allocation4], 4294967280 }
 0x386   :  { %1172 = vsyncpa [#allocation3], 1 }
 0x387   :  { %1173 = vsyncpa [#allocation6], 1 }
 0x388   :  { %1174 = vsyncpa [#allocation4], 1 }

</bundles_post_ra>
